<compile_context>
chip_gen: v7x
topology: tpu7x:2x2x1
jax: 0.10.0
libtpu: 0.0.40
codegen_flags: <defaults>
</compile_context>

<pallas_src>
import functools

import jax
import jax.numpy as jnp
from jax.experimental import pallas as pl
from jax.experimental.pallas import tpu as pltpu


def _attention_kernel(x_ref, w_ref, ctx_ref, m_sc, l_sc, acc_sc, *,
                      seq_len, seq_block, need_mask):
    """One (batch-block, seq-block) step of attention pooling.

    x_ref:   (Bb, tS, H)  encoder outputs block (input dtype, upcast inside)
    w_ref:   (1, H)       attention vector = nn.Linear(H, 1).weight
    ctx_ref: (Bb, H)      pooled context vectors (written on last seq block)
    m_sc:    (Bb, 1) f32  running max        (VMEM scratch)
    l_sc:    (Bb, 1) f32  running softmax denominator
    acc_sc:  (Bb, H) f32  running weighted sum
    """
    ks = pl.program_id(1)
    ns = pl.num_programs(1)

    @pl.when(ks == 0)
    def _():
        m_sc[...] = jnp.full_like(m_sc, -1e30)
        l_sc[...] = jnp.zeros_like(l_sc)
        acc_sc[...] = jnp.zeros_like(acc_sc)

    x = x_ref[...].astype(jnp.float32)            # (Bb, tS, H)
    w = w_ref[...].astype(jnp.float32)            # (1, H)

    if need_mask:
        # Last seq block overhangs the real sequence: zero out-of-range
        # positions (guards against garbage in the padded DMA region) and push
        # their scores to -inf-like so they contribute nothing to the softmax.
        pos = ks * seq_block + jax.lax.broadcasted_iota(
            jnp.int32, (1, seq_block), 1)          # (1, tS)
        valid = pos < seq_len                      # (1, tS)
        x = jnp.where(valid[:, :, None], x, 0.0)

    # scores[b, s] = <x[b, s, :], w>   (bias dropped: softmax is shift-invariant)
    scores = jnp.sum(x * w[None, :, :], axis=-1)   # (Bb, tS)
    if need_mask:
        scores = jnp.where(valid, scores, -1e30)

    # Online (flash-style) softmax accumulation over the sequence axis.
    m_prev = m_sc[...]                                           # (Bb, 1)
    m_new = jnp.maximum(m_prev, jnp.max(scores, axis=-1, keepdims=True))
    alpha = jnp.exp(m_prev - m_new)                              # (Bb, 1)
    p = jnp.exp(scores - m_new)                                  # (Bb, tS)
    l_sc[...] = alpha * l_sc[...] + jnp.sum(p, axis=-1, keepdims=True)
    acc_sc[...] = alpha * acc_sc[...] + jnp.sum(p[:, :, None] * x, axis=1)
    m_sc[...] = m_new

    @pl.when(ks == ns - 1)
    def _():
        # (Bb, 1) exact reciprocal, then one broadcast multiply on the
        # lane-dense (Bb, H) accumulator.
        inv = pl.reciprocal(l_sc[...], approx=False)
        ctx_ref[...] = (acc_sc[...] * inv).astype(ctx_ref.dtype)


def _choose_blocks(B, S, H, *, target_block_bytes=4 << 20,
                   batch_block=None, seq_block=None):
    """Pick (batch_block, seq_block) targeting ~target_block_bytes of f32
    working set per x-block.  Blocks satisfy the TPU (8, 128) rule: the
    sublane dim is a multiple of 8 or equal to the full array dim; the lane
    dim is always the full H."""
    f32 = 4

    if seq_block is None:
        if S * H * f32 <= target_block_bytes:
            ts = S                                   # whole sequence resident
        else:
            ts = max(8, (target_block_bytes // (8 * H * f32) // 8) * 8)
            if ts >= S:
                ts = S
    else:
        ts = min(int(seq_block), S)
        if ts < S:
            ts = max(8, (ts // 8) * 8)
            if ts >= S:
                ts = S

    if batch_block is None:
        per_row = ts * H * f32
        bb = max(1, target_block_bytes // per_row)
        if bb >= B:
            bb = B
        else:
            bb = max(8, (bb // 8) * 8)
            if bb >= B:
                bb = B
    else:
        bb = min(int(batch_block), B)
        if bb < B:
            bb = max(8, (bb // 8) * 8)
            if bb >= B:
                bb = B

    return bb, ts


def attention_forward(encoder_outputs, weight, bias=None, *,
                      target_block_bytes=4 << 20,
                      batch_block=None, seq_block=None):
    """Pallas TPU port of the PyTorch Attention.forward.

    encoder_outputs: (B, S, H)   (f32 or bf16 — DMA'd in its own dtype)
    weight:          (1, H)      nn.Linear(H, 1).weight
    bias:            (1,)        nn.Linear(H, 1).bias — exact no-op (softmax
                                 over the seq axis is shift-invariant), unused.
    returns:         (B, H)      context vectors, same dtype as input.
    """
    del bias  # mathematically a no-op for this module
    B, S, H = encoder_outputs.shape
    out_dtype = encoder_outputs.dtype

    bb, ts = _choose_blocks(B, S, H, target_block_bytes=target_block_bytes,
                            batch_block=batch_block, seq_block=seq_block)
    grid_b = pl.cdiv(B, bb)
    grid_s = pl.cdiv(S, ts)
    need_mask = (S % ts) != 0

    w = jnp.asarray(weight).reshape(1, H).astype(jnp.float32)

    kernel = functools.partial(_attention_kernel, seq_len=S, seq_block=ts,
                               need_mask=need_mask)

    out = pl.pallas_call(
        kernel,
        out_shape=jax.ShapeDtypeStruct((B, H), out_dtype),
        grid_spec=pltpu.PrefetchScalarGridSpec(
            num_scalar_prefetch=0,
            grid=(grid_b, grid_s),
            in_specs=[
                pl.BlockSpec((bb, ts, H), lambda i, k: (i, k, 0)),   # x block
                pl.BlockSpec((1, H), lambda i, k: (0, 0)),           # attn w
            ],
            out_specs=pl.BlockSpec((bb, H), lambda i, k: (i, 0)),
            scratch_shapes=[
                pltpu.VMEM((bb, 1), jnp.float32),   # running max
                pltpu.VMEM((bb, 1), jnp.float32),   # running denom
                pltpu.VMEM((bb, H), jnp.float32),   # running weighted sum
            ],
        ),
        compiler_params=pltpu.CompilerParams(
            # Batch blocks independent (megacore-shardable); seq axis is the
            # online-softmax reduction and must stay sequential.
            dimension_semantics=("parallel", "arbitrary"),
            # Above the 16/32 MiB scoped defaults, below v7x's 64 MiB physical.
            vmem_limit_bytes=48 * 1024 * 1024,
        ),
    )(encoder_outputs, w)

    return out


# ------------------- pure-JAX reference (correctness check) -------------------
def attention_ref(encoder_outputs, weight, bias):
    scores = encoder_outputs @ weight.T + bias        # (B, S, 1)
    attn = jax.nn.softmax(scores, axis=1)             # softmax over seq axis
    return jnp.sum(attn * encoder_outputs, axis=1)    # (B, H)


if __name__ == "__main__":
    key = jax.random.PRNGKey(0)

    # --- primary small-shape check (matches the module's intended usage) ---
    batch, seq_len, hidden = 2, 8, 32
    kx, kw, kb = jax.random.split(key, 3)
    x = jax.random.normal(kx, (batch, seq_len, hidden), jnp.float32)
    bound = 1.0 / float(hidden) ** 0.5
    weight = jax.random.uniform(kw, (1, hidden), jnp.float32, -bound, bound)
    bias = jax.random.uniform(kb, (1,), jnp.float32, -bound, bound)

    out = attention_forward(x, weight, bias)
    out = jax.block_until_ready(out)
    ref = attention_ref(x, weight, bias)
    assert out.shape == (batch, hidden)
    assert jnp.allclose(out, ref, atol=1e-5, rtol=1e-5), "mismatch (small case)"

    # --- exercise the tiled / edge-block path (online softmax + masking) ---
    b2, s2, h2 = 10, 20, 32
    kx2, kw2, kb2 = jax.random.split(jax.random.PRNGKey(1), 3)
    x2 = jax.random.normal(kx2, (b2, s2, h2), jnp.float32)
    bound2 = 1.0 / float(h2) ** 0.5
    w2 = jax.random.uniform(kw2, (1, h2), jnp.float32, -bound2, bound2)
    bi2 = jax.random.uniform(kb2, (1,), jnp.float32, -bound2, bound2)

    out2 = attention_forward(x2, w2, bi2, batch_block=8, seq_block=8)
    out2 = jax.block_until_ready(out2)
    ref2 = attention_ref(x2, w2, bi2)
    assert out2.shape == (b2, h2)
    assert jnp.allclose(out2, ref2, atol=1e-5, rtol=1e-5), "mismatch (tiled case)"

    print("KERNEL_OK")
</pallas_src>

<mosaic_0001>
module attributes {stable_mosaic.version = 11 : i64} {
  func.func @_attention_kernel(%arg0: i32, %arg1: i32, %arg2: memref<2x8x32xf32, #tpu.memory_space<vmem>>, %arg3: memref<1x32xf32, #tpu.memory_space<vmem>>, %arg4: memref<2x32xf32, #tpu.memory_space<vmem>>, %arg5: memref<2x1xf32, #tpu.memory_space<vmem>>, %arg6: memref<2x1xf32, #tpu.memory_space<vmem>>, %arg7: memref<2x32xf32, #tpu.memory_space<vmem>>) attributes {dimension_semantics = [#tpu.dimension_semantics<parallel>, #tpu.dimension_semantics<arbitrary>], iteration_bounds = array<i64: 1, 1>, scalar_prefetch = 0 : i64, scratch_operands = 3 : i64, tpu.core_type = #tpu.core_type<tc>, window_params = [{transform_indices = @transform_0, window_bounds = array<i64: 2, 8, 32>}, {pipeline_mode = #tpu.pipeline_mode<synchronous>, transform_indices = @transform_1, window_bounds = array<i64: 1, 32>}, {transform_indices = @transform_2, window_bounds = array<i64: 2, 32>}]} {
    %c0_i32 = arith.constant 0 : i32
    %0 = arith.cmpi eq, %arg1, %c0_i32 : i32
    %1 = arith.extui %0 : i1 to i32
    %c0_i32_0 = arith.constant 0 : i32
    %2 = arith.cmpi ne, %1, %c0_i32_0 : i32
    scf.if %2 {
      %cst_22 = arith.constant -1.000000e+30 : f32
      %37 = vector.broadcast %cst_22 : f32 to vector<2x1xf32>
      %c0_23 = arith.constant 0 : index
      %c0_24 = arith.constant 0 : index
      %38 = vector.load %arg5[%c0_23, %c0_24] : memref<2x1xf32, #tpu.memory_space<vmem>>, vector<2x1xf32>
      tpu.vector_store %arg5[%c0_23, %c0_24], %37 {strides = array<i32>} : memref<2x1xf32, #tpu.memory_space<vmem>>, vector<2x1xf32>,
      %cst_25 = arith.constant 0.000000e+00 : f32
      %39 = vector.broadcast %cst_25 : f32 to vector<2x1xf32>
      %c0_26 = arith.constant 0 : index
      %c0_27 = arith.constant 0 : index
      %40 = vector.load %arg6[%c0_26, %c0_27] : memref<2x1xf32, #tpu.memory_space<vmem>>, vector<2x1xf32>
      tpu.vector_store %arg6[%c0_26, %c0_27], %39 {strides = array<i32>} : memref<2x1xf32, #tpu.memory_space<vmem>>, vector<2x1xf32>,
      %cst_28 = arith.constant 0.000000e+00 : f32
      %41 = vector.broadcast %cst_28 : f32 to vector<2x32xf32>
      %c0_29 = arith.constant 0 : index
      %c0_30 = arith.constant 0 : index
      %42 = vector.load %arg7[%c0_29, %c0_30] : memref<2x32xf32, #tpu.memory_space<vmem>>, vector<2x32xf32>
      tpu.vector_store %arg7[%c0_29, %c0_30], %41 {strides = array<i32>} : memref<2x32xf32, #tpu.memory_space<vmem>>, vector<2x32xf32>,
    } else {
    }
    %c0 = arith.constant 0 : index
    %c0_1 = arith.constant 0 : index
    %c0_2 = arith.constant 0 : index
    %3 = vector.load %arg2[%c0, %c0_1, %c0_2] : memref<2x8x32xf32, #tpu.memory_space<vmem>>, vector<2x8x32xf32>
    %c0_3 = arith.constant 0 : index
    %c0_4 = arith.constant 0 : index
    %4 = vector.load %arg3[%c0_3, %c0_4] : memref<1x32xf32, #tpu.memory_space<vmem>>, vector<1x32xf32>
    %5 = vector.shape_cast %4 : vector<1x32xf32> to vector<1x1x32xf32>
    %6 = vector.broadcast %5 : vector<1x1x32xf32> to vector<2x8x32xf32>
    %7 = arith.mulf %3, %6 : vector<2x8x32xf32>
    %cst = arith.constant dense<0.000000e+00> : vector<2x8xf32>
    %8 = vector.multi_reduction <add>, %7, %cst [2] : vector<2x8x32xf32> to vector<2x8xf32>
    %c0_5 = arith.constant 0 : index
    %c0_6 = arith.constant 0 : index
    %9 = vector.load %arg5[%c0_5, %c0_6] : memref<2x1xf32, #tpu.memory_space<vmem>>, vector<2x1xf32>
    %cst_7 = arith.constant dense<0xFF800000> : vector<2xf32>
    %10 = vector.multi_reduction <maximumf>, %8, %cst_7 [1] : vector<2x8xf32> to vector<2xf32>
    %11 = vector.shape_cast %10 : vector<2xf32> to vector<2x1xf32>
    %12 = arith.maximumf %9, %11 : vector<2x1xf32>
    %13 = arith.subf %9, %12 : vector<2x1xf32>
    %14 = math.exp %13 : vector<2x1xf32>
    %15 = vector.broadcast %12 : vector<2x1xf32> to vector<2x8xf32>
    %16 = arith.subf %8, %15 : vector<2x8xf32>
    %17 = math.exp %16 : vector<2x8xf32>
    %c0_8 = arith.constant 0 : index
    %c0_9 = arith.constant 0 : index
    %18 = vector.load %arg6[%c0_8, %c0_9] : memref<2x1xf32, #tpu.memory_space<vmem>>, vector<2x1xf32>
    %19 = arith.mulf %14, %18 : vector<2x1xf32>
    %cst_10 = arith.constant dense<0.000000e+00> : vector<2xf32>
    %20 = vector.multi_reduction <add>, %17, %cst_10 [1] : vector<2x8xf32> to vector<2xf32>
    %21 = vector.shape_cast %20 : vector<2xf32> to vector<2x1xf32>
    %22 = arith.addf %19, %21 : vector<2x1xf32>
    %c0_11 = arith.constant 0 : index
    %c0_12 = arith.constant 0 : index
    %23 = vector.load %arg6[%c0_11, %c0_12] : memref<2x1xf32, #tpu.memory_space<vmem>>, vector<2x1xf32>
    tpu.vector_store %arg6[%c0_11, %c0_12], %22 {strides = array<i32>} : memref<2x1xf32, #tpu.memory_space<vmem>>, vector<2x1xf32>,
    %c0_13 = arith.constant 0 : index
    %c0_14 = arith.constant 0 : index
    %24 = vector.load %arg7[%c0_13, %c0_14] : memref<2x32xf32, #tpu.memory_space<vmem>>, vector<2x32xf32>
    %25 = vector.broadcast %14 : vector<2x1xf32> to vector<2x32xf32>
    %26 = arith.mulf %25, %24 : vector<2x32xf32>
    %27 = vector.shape_cast %17 : vector<2x8xf32> to vector<2x8x1xf32>
    %28 = vector.broadcast %27 : vector<2x8x1xf32> to vector<2x8x32xf32>
    %29 = arith.mulf %28, %3 : vector<2x8x32xf32>
    %cst_15 = arith.constant dense<0.000000e+00> : vector<2x32xf32>
    %30 = vector.multi_reduction <add>, %29, %cst_15 [1] : vector<2x8x32xf32> to vector<2x32xf32>
    %31 = arith.addf %26, %30 : vector<2x32xf32>
    %c0_16 = arith.constant 0 : index
    %c0_17 = arith.constant 0 : index
    %32 = vector.load %arg7[%c0_16, %c0_17] : memref<2x32xf32, #tpu.memory_space<vmem>>, vector<2x32xf32>
    tpu.vector_store %arg7[%c0_16, %c0_17], %31 {strides = array<i32>} : memref<2x32xf32, #tpu.memory_space<vmem>>, vector<2x32xf32>,
    %c0_18 = arith.constant 0 : index
    %c0_19 = arith.constant 0 : index
    %33 = vector.load %arg5[%c0_18, %c0_19] : memref<2x1xf32, #tpu.memory_space<vmem>>, vector<2x1xf32>
    tpu.vector_store %arg5[%c0_18, %c0_19], %12 {strides = array<i32>} : memref<2x1xf32, #tpu.memory_space<vmem>>, vector<2x1xf32>,
    %c0_i32_20 = arith.constant 0 : i32
    %34 = arith.cmpi eq, %arg1, %c0_i32_20 : i32
    %35 = arith.extui %34 : i1 to i32
    %c0_i32_21 = arith.constant 0 : i32
    %36 = arith.cmpi ne, %35, %c0_i32_21 : i32
    scf.if %36 {
      %c0_22 = arith.constant 0 : index
      %c0_23 = arith.constant 0 : index
      %37 = vector.load %arg6[%c0_22, %c0_23] : memref<2x1xf32, #tpu.memory_space<vmem>>, vector<2x1xf32>
      %38 = tpu.reciprocal %37 : vector<2x1xf32> -> vector<2x1xf32>
      %c0_24 = arith.constant 0 : index
      %c0_25 = arith.constant 0 : index
      %39 = vector.load %arg7[%c0_24, %c0_25] : memref<2x32xf32, #tpu.memory_space<vmem>>, vector<2x32xf32>
      %40 = vector.broadcast %38 : vector<2x1xf32> to vector<2x32xf32>
      %41 = arith.mulf %39, %40 : vector<2x32xf32>
      %c0_26 = arith.constant 0 : index
      %c0_27 = arith.constant 0 : index
      %42 = vector.load %arg4[%c0_26, %c0_27] : memref<2x32xf32, #tpu.memory_space<vmem>>, vector<2x32xf32>
      tpu.vector_store %arg4[%c0_26, %c0_27], %41 {strides = array<i32>} : memref<2x32xf32, #tpu.memory_space<vmem>>, vector<2x32xf32>,
    } else {
    }
    return
  }
  func.func @transform_0(%arg0: i32, %arg1: i32) -> (i32, i32, i32) {
    %c0_i32 = arith.constant 0 : i32
    %c0_i32_0 = arith.constant 0 : i32
    return %arg0, %arg1, %c0_i32 : i32, i32, i32
  }
  func.func @transform_1(%arg0: i32, %arg1: i32) -> (i32, i32) {
    %c0_i32 = arith.constant 0 : i32
    %c0_i32_0 = arith.constant 0 : i32
    %c0_i32_1 = arith.constant 0 : i32
    return %c0_i32, %c0_i32_0 : i32, i32
  }
  func.func @transform_2(%arg0: i32, %arg1: i32) -> (i32, i32) {
    %c0_i32 = arith.constant 0 : i32
    %c0_i32_0 = arith.constant 0 : i32
    return %arg0, %c0_i32 : i32, i32
  }
}

</mosaic_0001>

<bundles_post_ra>
// kernel: tpu_custom_call.1
= control target key start
LH: loop header
LB: loop body
LE: loop exit
PB: predicated region body
PF: predicated region fallthrough
CT: control target
= control target key end

     0   :  { %7 = vsyncpa [#allocation6], 0  ;;  %s315_s0 = inlined_call_operand.hbm [shape: f32[2,8,32], index: 0, kind: input, shape index: {}]   ;;  %s316_s1 = inlined_call_operand.vmem [shape: f32[1,32], index: 1, kind: input, shape index: {}]   ;;  %s317_s2 = inlined_call_operand.hbm [shape: f32[2,32], index: 2, kind: output, shape index: {}]  }
   0x1   :  { %8 = vsyncpa [#allocation7], 0  ;;  %s250_s9 = smov [#allocation5]   ;;  %s202_s13 = scalar_lea.hbm %s315_s0, 256 }
   0x2   :  { %s14_s10 = sshll.u32 %s250_s9, 4  ;;  %p203_p0 = scmp.ne.s32.totalorder %s315_s0, %s202_s13  ;;  %s15_s10 = int_to_ptr.vmem [resolvable:$true] %s14_s10 }
   0x3   :  { %p206_p1 = scmp.lt.u32.totalorder %s202_s13, %s315_s0 }
   0x5   :  { %p208_p2 = pnand %p206_p1, %p203_p0 }
   0x7   :  { %211 = shalt.err (!%p208_p2)
}
   0x8   :  { %s212_s18 = scalar_lea.vmem %s15_s10, 256  ;;  %p217_p4 = scmp.lt.s32.totalorder %s15_s10, %s15_s10 }
   0x9   :  { %p213_p3 = scmp.ne.s32.totalorder %s15_s10, %s212_s18  ;;  %p218_p5 = scmp.lt.s32.totalorder %s212_s18, %s212_s18 }
   0xb   :  { %p219_p6 = por %p218_p5, %p217_p4 }
   0xd   :  { %p220_p7 = pnand %p219_p6, %p213_p3 }
   0xf   :  { %223 = shalt.err (!%p220_p7)
}
  0x10   :  { %s251_s19 = smov 128   ;;  %s252_s20 = smov 8  }
  0x11   :  { %20 = dma.hbm_to_vmem [thread:$0]  %s315_s0, 256, %s15_s10, [#allocation6], %s251_s19, %s251_s19, %s252_s20  }
  0x12   :  { %246 = dma.done.wait [#allocation6], 256  }
  0x13   :  { %247 = vsyncadd [#allocation6], 4294967040  ;;  %v35_v0 = vld [vmem:[#allocation5] sm:$0xff]  ;;  %v184_v1 = vld [vmem:[%s316_s1] ss:$0 sm:$0xff]  ;;  %vm46_vm0 = vcmask 261120   ;;  %v56_v8 = vlaneseq }
  0x14   :  { %v36_v2 = vld [vmem:[#allocation5 + $0x8] sm:$0xff]  ;;  %v44_v3 = vmul.f32 %v184_v1, %v35_v0  ;;  %vm30_vm1 = vcmask 1024   ;;  %v253_v7 = vmov -1e+30   ;;  %vm66_vm2 = vcmask 1041409   ;;  %s256_s0 = smov [#allocation8]  }
  0x15   :  { %v45_v4 = vmul.f32 %v184_v1, %v36_v2  ;;  %31 = vst.msk [vmem:[#allocation2] sm:$0x3] %vm30_vm1, %v253_v7  ;;  %v57_v9 = vand.u32 127, %v56_v8  ;;  %v59_v10 = vshrl.u32 %v56_v8, 7  ;;  %vm69_vm3 = vcmask 58368   ;;  %s175_s1 = sshll.u32 %s256_s0, 4  ;;  %s176_s1 = int_to_ptr.vmem [resolvable:$true] %s175_s1 }
  0x16   :  { %v47_v5 = vsel %vm46_vm0, %v44_v3, 0.0  ;;  %v254_v18 = vmov 0   ;;  %v255_v19 = vmov 0.0   ;;  %vm33_vm4 = vcmask 254976   ;;  %s224_s25 = scalar_lea.vmem %s176_s1, 32  ;;  %p229_p9 = scmp.lt.s32.totalorder %s176_s1, %s176_s1 }
  0x17   :  { %48 = vadd.xlane.f32.xlu0 %v47_v5  ;;  %v50_v6 = vsel %vm46_vm0, %v45_v4, 0.0  ;;  %v60_v12 = vsub.s32 %v57_v9, %v59_v10  ;;  %192 = vset.pattern.permute.xlu1 %v254_v18  ;;  %32 = vst.msk [vmem:[#allocation3] sm:$0x3] %vm30_vm1, %v255_v19  ;;  %v83_v24 = vsub.s32 0, %v59_v10  ;;  %v87_v25 = vsub.s32 1, %v59_v10  ;;  %p225_p8 = scmp.ne.s32.totalorder %s176_s1, %s224_s25  ;;  %p230_p10 = scmp.lt.s32.totalorder %s224_s25, %s224_s25 }
  0x18   :  { %193 = vset.pattern.permute.xlu0 %v254_v18  ;;  %34 = vst.msk [vmem:[#allocation4] sm:$0x3] %vm33_vm4, %v255_v19 }
  0x19   :  { %p231_p11 = por %p230_p10, %p229_p9 }
  0x1b   :  { %51 = vadd.xlane.f32.xlu0 %v50_v6  ;;  %p232_p12 = pnand %p231_p11, %p225_p8 }
  0x1c   :  { %v53_v20 = vld [vmem:[#allocation2] sm:$0x3] }
  0x1f   :  { %v123_v57 = vld [vmem:[#allocation4] sm:$0x3] }
  0xa4   :  { %v49_v11 = vpop.xlane.xlu0 %48 }
  0xa5   :  { %v61_v14 = vrot.slane %v49_v11, %v60_v12 }
  0xa8   :  { %v52_v13 = vpop.xlane.xlu0 %51 }
  0xa9   :  { %v65_v15 = vrot.slane %v52_v13, %v60_v12 }
  0xab   :  { %v67_v16 = vsel %vm66_vm2, %v65_v15, %v61_v14 }
  0xac   :  { %v70_v17 = vsel %vm69_vm3, %v67_v16, -inf }
  0xad   :  { %71 = vmax.xlane.f32.xlu1 %v70_v17 }
 0x13a   :  { %v72_v21 = vpop.xlane.xlu1 %71 }
 0x13b   :  { %v73_v22 = vmax.f32 %v53_v20, %v72_v21 }
 0x13d   :  { %v74_v23 = vsub.f32 %v53_v20, %v73_v22  ;;  %155 = vst.msk [vmem:[#allocation2] sm:$0x3] %vm30_vm1, %v73_v22  ;;  %79 = vperm.xlu1 %192, %v73_v22  }
 0x13f   :  { %v75_v33 = vmul.f32 1.442695, %v74_v23 }
 0x1bc   :  { %v80_v26 = vpop.permute.xlu1 %79 }
 0x1bd   :  { %v84_v27 = vrot.slane %v80_v26, %v83_v24  ;;  %v88_v28 = vrot.slane %v80_v26, %v87_v25 }
 0x1bf   :  { %v91_v29 = vsub.f32 %v49_v11, %v84_v27  ;;  %v92_v30 = vsub.f32 %v52_v13, %v88_v28 }
 0x1c1   :  { %v93_v31 = vmul.f32 1.442695, %v91_v29  ;;  %v95_v32 = vmul.f32 1.442695, %v92_v30 }
 0x1c3   :  { %194 = vpow2.f32 %v93_v31 }
 0x1c4   :  { %196 = vpow2.f32 %v95_v32 }
 0x1c5   :  { %198 = vpow2.f32 %v75_v33 }
 0x1cd   :  { %v195_v34 = vpop.eup %194 }
 0x1ce   :  { %v197_v35 = vpop.eup %196  ;;  %102 = vperm.xlu0 %193, %v195_v34  }
 0x1cf   :  { %105 = vperm.xlu1 %192, %v197_v35   ;;  %v199_v36 = vpop.eup %198 }
 0x1d2   :  { %126 = vperm.xlu0 %193, %v199_v36  }
 0x24d   :  { %v103_v37 = vpop.permute.xlu0 %102 }
 0x24e   :  { %v106_v38 = vpop.permute.xlu1 %105  ;;  %v110_v39 = vrot.slane %v103_v37, %v60_v12  ;;  %v132_v40 = vmul.f32 %v103_v37, %v35_v0  ;;  %v97_v0 = vld [vmem:[#allocation3] sm:$0x3] }
 0x24f   :  { %v114_v41 = vrot.slane %v106_v38, %v60_v12  ;;  %v133_v42 = vmul.f32 %v106_v38, %v36_v2  ;;  %v98_v1 = vmul.f32 %v199_v36, %v97_v0 }
 0x250   :  { %v134_v43 = vsel %vm46_vm0, %v132_v40, 0.0 }
 0x251   :  { %v141_v44 = vsel %vm46_vm0, %v133_v42, 0.0  ;;  %v135_v45 = vrot.slane %v134_v43, 4  ;;  %v115_v46 = vsel %vm66_vm2, %v114_v41, %v110_v39  ;;  %v127_v58 = vpop.permute.xlu0 %126 }
 0x252   :  { %v142_v47 = vrot.slane %v141_v44, 4  ;;  %v117_v48 = vsel %vm69_vm3, %v115_v46, 0.0  ;;  %v129_v61 = vmul.f32 %v127_v58, %v123_v57 }
 0x253   :  { %v136_v49 = vadd.f32 %v135_v45, %v134_v43  ;;  %118 = vadd.xlane.f32.xlu1 %v117_v48 }
 0x254   :  { %v143_v50 = vadd.f32 %v142_v47, %v141_v44 }
 0x255   :  { %v137_v51 = vrot.slane %v136_v49, 2 }
 0x256   :  { %v144_v52 = vrot.slane %v143_v50, 2 }
 0x257   :  { %v138_v53 = vadd.f32 %v137_v51, %v136_v49 }
 0x258   :  { %v145_v54 = vadd.f32 %v144_v52, %v143_v50 }
 0x259   :  { %v139_v55 = vrot.slane %v138_v53, 1 }
 0x25a   :  { %v146_v56 = vrot.slane %v145_v54, 1 }
 0x25b   :  { %v140_v59 = vadd.f32 %v139_v55, %v138_v53 }
 0x25c   :  { %v147_v60 = vadd.f32 %v146_v56, %v145_v54 }
 0x25e   :  { %v150_v62 = vsel %vm66_vm2, %v147_v60, %v140_v59 }
 0x25f   :  { %v152_v63 = vadd.f32 %v150_v62, %v129_v61 }
 0x261   :  { %154 = vst.msk [vmem:[#allocation4] sm:$0x3] %vm33_vm4, %v152_v63 }
 0x268   :  { %v161_v6 = vld [vmem:[#allocation4] sm:$0x3] }
 0x2e0   :  { %v119_v2 = vpop.xlane.xlu1 %118 }
 0x2e1   :  { %v120_v3 = vadd.f32 %v119_v2, %v98_v1 }
 0x2e3   :  { %122 = vst.msk [vmem:[#allocation3] sm:$0x3] %vm30_vm1, %v120_v3 }
 0x2ea   :  { %v159_v4 = vld [vmem:[#allocation3] sm:$0x3] }
 0x2eb   :  { %200 = vrcp.f32 %v159_v4 }
 0x2f5   :  { %v201_v5 = vpop.eup %200 }
 0x2f6   :  { %164 = vperm.xlu0 %193, %v201_v5  }
 0x375   :  { %v165_v7 = vpop.permute.xlu0 %164 }
 0x376   :  { %v167_v8 = vmul.f32 %v165_v7, %v161_v6 }
 0x378   :  { %168 = vst.msk [vmem:[#allocation8] sm:$0x3] %vm33_vm4, %v167_v8 }
 0x379   :  { %235 = shalt.err (!%p232_p12)
}
 0x37a   :  { %s236_s28 = scalar_lea.hbm %s317_s2, 32 }
 0x37b   :  { %p237_p13 = scmp.ne.s32.totalorder %s317_s2, %s236_s28  ;;  %p240_p0 = scmp.lt.u32.totalorder %s236_s28, %s317_s2 }
 0x37d   :  { %p242_p1 = pnand %p240_p0, %p237_p13 }
 0x37f   :  { %245 = shalt.err (!%p242_p1)
}
 0x380   :  { %178 = dma.vmem_to_hbm [thread:$0]  %s176_s1, 32, %s317_s2, [#allocation7]  }
 0x381   :  { %248 = dma.done.wait [#allocation7], 32  }
 0x382   :  { %249 = vsyncadd [#allocation7], 4294967264 }
 0x383   :  { %182 = vsyncpa [#allocation6], 1 }
 0x384   :  { %183 = vsyncpa [#allocation7], 1 }

</bundles_post_ra>
